<compile_context>
chip_gen: v7x
topology: tpu7x:2x2x1
jax: 0.10.0
libtpu: 0.0.40
codegen_flags: <defaults>
</compile_context>

<pallas_src>
import jax
import jax.numpy as jnp
from jax.experimental import pallas as pl
from jax.experimental.pallas import tpu as pltpu


def _sublane_multiple(dtype):
    """Minimum second-to-last tile dim for this dtype (f32->8, bf16->16, int8->32)."""
    return max(8, 32 // jnp.dtype(dtype).itemsize)


def _vmem_budget():
    """Return (live-data budget, vmem_limit_bytes) derived from physical VMEM.

    v5e/v6e: 128 MiB physical -> limit 96 MiB, live budget 64 MiB.
    v7x    :  64 MiB physical -> limit 48 MiB, live budget 32 MiB.
    The fallback assumes the smallest (v7x) case, so a failed query only costs perf.
    """
    phys = 64 << 20
    try:
        phys = int(pltpu.get_tpu_info().vmem_capacity_bytes)
    except Exception:
        pass
    limit = min((phys * 3) // 4, 96 << 20)
    budget = (limit * 2) // 3          # headroom for compiler temporaries / pipeline
    return budget, limit


def _pick_tiles(n_rows, n_cols, dtype, budget_bytes):
    """Pick (tn, tc) so p+q double-buffered input tiles PLUS ~4 f32 elementwise
    intermediates (upcast p/q, m, inv_m, integrand) fit the live-VMEM budget."""
    itemsize = jnp.dtype(dtype).itemsize
    sub = _sublane_multiple(dtype)
    bytes_per_elem = 2 * 2 * itemsize + 4 * 4     # inputs (x2 buffers) + f32 temps
    elem_budget = max(budget_bytes // bytes_per_elem, sub * 128)
    if n_cols * sub <= elem_budget:
        tc = n_cols                                # full lane extent, no C tiling
        tn = min(elem_budget // max(n_cols, 1), 1024, n_rows)
        tn = n_rows if tn >= n_rows else max(sub, (tn // sub) * sub)
    else:
        # vocab-scale C: tile the lane axis in multiples of 128, minimal row tile
        tn = min(sub, n_rows)
        tc = max(128, (elem_budget // max(tn, 1) // 128) * 128)
        tc = min(tc, n_cols)
    return tn, tc


def _make_in_spec(block_shape, index_map, extra_buffering):
    if extra_buffering and hasattr(pl, "Buffered"):
        try:
            return pl.BlockSpec(block_shape, index_map, pipeline_mode=pl.Buffered(3))
        except TypeError:              # older jax without pipeline_mode kwarg
            pass
    return pl.BlockSpec(block_shape, index_map)


def jsd_loss(ps, qs, ws=None, *, tn=None, tc=None, n_splits=None):
    """ps, qs: (B, N, C); ws: (B,) or None (assumed >= 0, as in the torch.ones default).
    Returns the scalar f32 JSD loss."""
    B, N, C = ps.shape
    assert qs.shape == (B, N, C)
    if ws is None:
        ws = jnp.ones((B,), dtype=jnp.float32)
    ws = ws.astype(jnp.float32)

    in_dtype = ps.dtype
    itemsize = jnp.dtype(in_dtype).itemsize
    sub = _sublane_multiple(in_dtype)
    budget, vmem_limit = _vmem_budget()

    auto_tn, auto_tc = _pick_tiles(N, C, in_dtype, budget)
    tn = auto_tn if tn is None else min(int(tn), N)
    tc = auto_tc if tc is None else min(int(tc), C)
    # Legalize user-provided tiles: dtype-aware sublane multiple / lane multiple of 128.
    if tn < N:
        tn = max(sub, (tn // sub) * sub)
    if tc < C:
        tc = max(128, (tc // 128) * 128)

    # Small-B work splitting so both TensorCores of a v7x chip get work.
    if n_splits is None:
        n_splits = 2 if (B == 1 and N > sub) else 1
    n_splits = max(1, int(n_splits))
    if n_splits > 1 and tn >= N:
        tn = max(sub, ((-(-N // n_splits)) // sub) * sub)

    nt_total = -(-N // tn)                      # total N tiles
    n_splits = min(n_splits, nt_total)
    ntps = -(-nt_total // n_splits)             # N tiles per split
    nc = -(-C // tc)                            # C tiles

    mask_rows = (n_splits * ntps * tn != N)     # ragged last tile and/or duplicate block
    mask_cols = (nc * tc != C)                  # ragged last C tile
    need_clamp = (n_splits * ntps != nt_total)  # some (split, n) map past the last block

    def in_index(b, s, n, c):
        blk = s * ntps + n
        if need_clamp:                          # duplicate block; its rows are masked out
            blk = jnp.minimum(blk, nt_total - 1)
        return (b, blk, c)

    def kernel(p_ref, q_ref, out_ref, kl_sum, max_acc):
        s = pl.program_id(1)
        n = pl.program_id(2)
        c = pl.program_id(3)

        @pl.when((n == 0) & (c == 0))
        def _():
            max_acc[...] = jnp.full_like(max_acc, -jnp.inf)

        @pl.when(c == 0)
        def _():
            kl_sum[...] = jnp.zeros_like(kl_sum)

        # Narrow (e.g. bf16) storage is upcast here; compute stays f32
        # (v5e has no bf16 VPU/EUP path).
        p = p_ref[...].astype(jnp.float32)          # (1, tn, tc)
        q = q_ref[...].astype(jnp.float32)
        m = 0.5 * (p + q)
        # One shared approximate reciprocal (EUP push) instead of two divides;
        # ~1e-4 relative error, well inside tolerance after the sqrt.
        inv_m = pl.reciprocal(m, approx=True)
        # Fused KL integrands -> a single lane reduction. Epsilon placement matches
        # the PyTorch reference: log(p/m + 1e-7).
        integrand = p * jnp.log(p * inv_m + 1e-7) + q * jnp.log(q * inv_m + 1e-7)
        if mask_cols:   # padded lanes of the last C tile contribute 0 to the sum
            col = c * tc + jax.lax.broadcasted_iota(jnp.int32, (1, tn, tc), 2)
            integrand = jnp.where(col < C, integrand, 0.0)
        kl_sum[...] += jnp.sum(integrand, axis=-1)   # (1, tn) lane reduction (XLU)

        @pl.when(c == nc - 1)
        def _():
            kl_half = 0.5 * kl_sum[...]
            if mask_rows:   # padded / duplicated rows never enter the running max
                row = (s * ntps + n) * tn + jax.lax.broadcasted_iota(
                    jnp.int32, (1, tn), 1)
                kl_half = jnp.where(row < N, kl_half, -jnp.inf)
            max_acc[...] = jnp.maximum(max_acc[...], kl_half)

        @pl.when((n == ntps - 1) & (c == nc - 1))
        def _():
            out_ref[...] = jnp.max(
                max_acc[...], axis=-1, keepdims=True).reshape(1, 1, 1, 1)

    tile_bytes = tn * tc * itemsize
    extra_buffering = (tile_bytes <= (512 << 10)) and (B * n_splits * ntps * nc >= 3)

    in_specs = [
        _make_in_spec((1, tn, tc), in_index, extra_buffering),   # ps tile
        _make_in_spec((1, tn, tc), in_index, extra_buffering),   # qs tile
    ]

    grid_spec = pltpu.PrefetchScalarGridSpec(
        num_scalar_prefetch=0,
        grid=(B, n_splits, ntps, nc),
        in_specs=in_specs,
        out_specs=pl.BlockSpec((1, 1, 1, 1), lambda b, s, n, c: (b, s, 0, 0)),
        scratch_shapes=[
            pltpu.VMEM((1, tn), jnp.float32),   # partial KL sum across C tiles
            pltpu.VMEM((1, tn), jnp.float32),   # running row-wise max across N tiles
        ],
    )

    partial_max = pl.pallas_call(
        kernel,
        out_shape=jax.ShapeDtypeStruct((B, n_splits, 1, 1), jnp.float32),
        grid_spec=grid_spec,
        compiler_params=pltpu.CompilerParams(
            dimension_semantics=("parallel", "parallel", "arbitrary", "arbitrary"),
            vmem_limit_bytes=int(vmem_limit),
        ),
    )(ps, qs)

    # Finalize in the wrapper: max over splits, then sqrt + weight + batch sum
    # (max commutes with sqrt and a non-negative weight).
    per_b = jnp.max(partial_max.reshape(B, n_splits), axis=1)
    return jnp.sum(ws * jnp.sqrt(per_b))


def _jsd_loss_ref(ps, qs, ws):
    """Pure-JAX reference mirroring the PyTorch module."""
    total = 0.0
    for b in range(ps.shape[0]):
        p = ps[b].T          # (C, N)
        q = qs[b].T
        m = 0.5 * (p + q)
        kl_p = jnp.sum(p * jnp.log(p / m + 1e-7), axis=0)
        kl_q = jnp.sum(q * jnp.log(q / m + 1e-7), axis=0)
        total += jnp.max(ws[b] * jnp.sqrt(0.5 * kl_p + 0.5 * kl_q))
    return total


if __name__ == "__main__":
    key = jax.random.PRNGKey(0)
    k1, k2, k3, k4, k5 = jax.random.split(key, 5)

    # Case 1: B=2, N=16, C=128  (single C tile; auto + forced multi-N-tile paths).
    B1, N1, C1 = 2, 16, 128
    ps1 = jax.nn.softmax(jax.random.normal(k1, (B1, N1, C1), jnp.float32), axis=-1)
    qs1 = jax.nn.softmax(jax.random.normal(k2, (B1, N1, C1), jnp.float32), axis=-1)
    ws1 = jax.random.uniform(k3, (B1,), jnp.float32, minval=0.5, maxval=1.5)

    ref1 = jax.block_until_ready(_jsd_loss_ref(ps1, qs1, ws1))
    ref1_ones = jax.block_until_ready(
        _jsd_loss_ref(ps1, qs1, jnp.ones((B1,), jnp.float32)))

    out_auto = jax.block_until_ready(jsd_loss(ps1, qs1, ws1))
    out_tiled = jax.block_until_ready(jsd_loss(ps1, qs1, ws1, tn=8))
    out_defw = jax.block_until_ready(jsd_loss(ps1, qs1, tn=8))      # Ws=None path

    assert jnp.allclose(out_auto, ref1, rtol=5e-3, atol=1e-5), (out_auto, ref1)
    assert jnp.allclose(out_tiled, ref1, rtol=5e-3, atol=1e-5), (out_tiled, ref1)
    assert jnp.allclose(out_defw, ref1_ones, rtol=5e-3, atol=1e-5), (out_defw, ref1_ones)

    # bf16 storage path (halves DMA bytes on bandwidth-bound v5e/v6e); compute is f32.
    ps1_b, qs1_b = ps1.astype(jnp.bfloat16), qs1.astype(jnp.bfloat16)
    ref1_b = jax.block_until_ready(
        _jsd_loss_ref(ps1_b.astype(jnp.float32), qs1_b.astype(jnp.float32), ws1))
    out_bf16 = jax.block_until_ready(jsd_loss(ps1_b, qs1_b, ws1))
    assert jnp.allclose(out_bf16, ref1_b, rtol=5e-3, atol=1e-5), (out_bf16, ref1_b)

    # Case 2: B=1, N=20, C=256 — exercises the small-B core split (2 parallel halves),
    # ragged N tiles, the clamped duplicate block, and (forced) C-axis tiling.
    B2, N2, C2 = 1, 20, 256
    ps2 = jax.nn.softmax(jax.random.normal(k4, (B2, N2, C2), jnp.float32), axis=-1)
    qs2 = jax.nn.softmax(jax.random.normal(k5, (B2, N2, C2), jnp.float32), axis=-1)
    ws2 = jnp.array([1.3], jnp.float32)

    ref2 = jax.block_until_ready(_jsd_loss_ref(ps2, qs2, ws2))
    out2_auto = jax.block_until_ready(jsd_loss(ps2, qs2, ws2))
    out2_ctile = jax.block_until_ready(jsd_loss(ps2, qs2, ws2, tn=8, tc=128))
    assert jnp.allclose(out2_auto, ref2, rtol=5e-3, atol=1e-5), (out2_auto, ref2)
    assert jnp.allclose(out2_ctile, ref2, rtol=5e-3, atol=1e-5), (out2_ctile, ref2)

    print("KERNEL_OK")
</pallas_src>

<mosaic_0001>
module attributes {stable_mosaic.version = 11 : i64} {
  func.func @kernel(%arg0: i32, %arg1: i32, %arg2: i32, %arg3: i32, %arg4: memref<1x16x128xf32, #tpu.memory_space<vmem>>, %arg5: memref<1x16x128xf32, #tpu.memory_space<vmem>>, %arg6: memref<1x1x1x1xf32, #tpu.memory_space<vmem>>, %arg7: memref<1x16xf32, #tpu.memory_space<vmem>>, %arg8: memref<1x16xf32, #tpu.memory_space<vmem>>) attributes {dimension_semantics = [#tpu.dimension_semantics<parallel>, #tpu.dimension_semantics<parallel>, #tpu.dimension_semantics<arbitrary>, #tpu.dimension_semantics<arbitrary>], iteration_bounds = array<i64: 2, 1, 1, 1>, scalar_prefetch = 0 : i64, scratch_operands = 2 : i64, tpu.core_type = #tpu.core_type<tc>, window_params = [{transform_indices = @transform_0, window_bounds = array<i64: 1, 16, 128>}, {transform_indices = @transform_1, window_bounds = array<i64: 1, 16, 128>}, {transform_indices = @transform_2, window_bounds = array<i64: 1, 1, 1, 1>}]} {
    %c0_i32 = arith.constant 0 : i32
    %0 = arith.cmpi eq, %arg2, %c0_i32 : i32
    %c0_i32_0 = arith.constant 0 : i32
    %1 = arith.cmpi eq, %arg3, %c0_i32_0 : i32
    %2 = arith.andi %0, %1 : i1
    %3 = arith.extui %2 : i1 to i32
    %c0_i32_1 = arith.constant 0 : i32
    %4 = arith.cmpi ne, %3, %c0_i32_1 : i32
    scf.if %4 {
      %cst_21 = arith.constant 0xFF800000 : f32
      %37 = vector.broadcast %cst_21 : f32 to vector<1x16xf32>
      %c0_22 = arith.constant 0 : index
      %c0_23 = arith.constant 0 : index
      %38 = vector.load %arg8[%c0_22, %c0_23] : memref<1x16xf32, #tpu.memory_space<vmem>>, vector<1x16xf32>
      tpu.vector_store %arg8[%c0_22, %c0_23], %37 {strides = array<i32>} : memref<1x16xf32, #tpu.memory_space<vmem>>, vector<1x16xf32>,
    } else {
    }
    %c0_i32_2 = arith.constant 0 : i32
    %5 = arith.cmpi eq, %arg3, %c0_i32_2 : i32
    %6 = arith.extui %5 : i1 to i32
    %c0_i32_3 = arith.constant 0 : i32
    %7 = arith.cmpi ne, %6, %c0_i32_3 : i32
    scf.if %7 {
      %cst_21 = arith.constant 0.000000e+00 : f32
      %37 = vector.broadcast %cst_21 : f32 to vector<1x16xf32>
      %c0_22 = arith.constant 0 : index
      %c0_23 = arith.constant 0 : index
      %38 = vector.load %arg7[%c0_22, %c0_23] : memref<1x16xf32, #tpu.memory_space<vmem>>, vector<1x16xf32>
      tpu.vector_store %arg7[%c0_22, %c0_23], %37 {strides = array<i32>} : memref<1x16xf32, #tpu.memory_space<vmem>>, vector<1x16xf32>,
    } else {
    }
    %c0 = arith.constant 0 : index
    %c0_4 = arith.constant 0 : index
    %c0_5 = arith.constant 0 : index
    %8 = vector.load %arg4[%c0, %c0_4, %c0_5] : memref<1x16x128xf32, #tpu.memory_space<vmem>>, vector<1x16x128xf32>
    %c0_6 = arith.constant 0 : index
    %c0_7 = arith.constant 0 : index
    %c0_8 = arith.constant 0 : index
    %9 = vector.load %arg5[%c0_6, %c0_7, %c0_8] : memref<1x16x128xf32, #tpu.memory_space<vmem>>, vector<1x16x128xf32>
    %10 = arith.addf %8, %9 : vector<1x16x128xf32>
    %cst = arith.constant 5.000000e-01 : f32
    %11 = vector.broadcast %cst : f32 to vector<1x16x128xf32>
    %12 = arith.mulf %11, %10 : vector<1x16x128xf32>
    %13 = tpu.reciprocal %12 {approx = true} : vector<1x16x128xf32> -> vector<1x16x128xf32>
    %14 = arith.mulf %8, %13 : vector<1x16x128xf32>
    %cst_9 = arith.constant 1.000000e-07 : f32
    %15 = vector.broadcast %cst_9 : f32 to vector<1x16x128xf32>
    %16 = arith.addf %14, %15 : vector<1x16x128xf32>
    %17 = math.log %16 : vector<1x16x128xf32>
    %18 = arith.mulf %8, %17 : vector<1x16x128xf32>
    %19 = arith.mulf %9, %13 : vector<1x16x128xf32>
    %cst_10 = arith.constant 1.000000e-07 : f32
    %20 = vector.broadcast %cst_10 : f32 to vector<1x16x128xf32>
    %21 = arith.addf %19, %20 : vector<1x16x128xf32>
    %22 = math.log %21 : vector<1x16x128xf32>
    %23 = arith.mulf %9, %22 : vector<1x16x128xf32>
    %24 = arith.addf %18, %23 : vector<1x16x128xf32>
    %c0_11 = arith.constant 0 : index
    %c0_12 = arith.constant 0 : index
    %25 = vector.load %arg7[%c0_11, %c0_12] : memref<1x16xf32, #tpu.memory_space<vmem>>, vector<1x16xf32>
    %cst_13 = arith.constant dense<0.000000e+00> : vector<1x16xf32>
    %26 = vector.multi_reduction <add>, %24, %cst_13 [2] : vector<1x16x128xf32> to vector<1x16xf32>
    %27 = arith.addf %25, %26 : vector<1x16xf32>
    %c0_14 = arith.constant 0 : index
    %c0_15 = arith.constant 0 : index
    %28 = vector.load %arg7[%c0_14, %c0_15] : memref<1x16xf32, #tpu.memory_space<vmem>>, vector<1x16xf32>
    tpu.vector_store %arg7[%c0_14, %c0_15], %27 {strides = array<i32>} : memref<1x16xf32, #tpu.memory_space<vmem>>, vector<1x16xf32>,
    %c0_i32_16 = arith.constant 0 : i32
    %29 = arith.cmpi eq, %arg3, %c0_i32_16 : i32
    %30 = arith.extui %29 : i1 to i32
    %c0_i32_17 = arith.constant 0 : i32
    %31 = arith.cmpi ne, %30, %c0_i32_17 : i32
    scf.if %31 {
      %c0_21 = arith.constant 0 : index
      %c0_22 = arith.constant 0 : index
      %37 = vector.load %arg7[%c0_21, %c0_22] : memref<1x16xf32, #tpu.memory_space<vmem>>, vector<1x16xf32>
      %cst_23 = arith.constant 5.000000e-01 : f32
      %38 = vector.broadcast %cst_23 : f32 to vector<1x16xf32>
      %39 = arith.mulf %38, %37 : vector<1x16xf32>
      %c0_24 = arith.constant 0 : index
      %c0_25 = arith.constant 0 : index
      %40 = vector.load %arg8[%c0_24, %c0_25] : memref<1x16xf32, #tpu.memory_space<vmem>>, vector<1x16xf32>
      %41 = arith.maximumf %40, %39 : vector<1x16xf32>
      %c0_26 = arith.constant 0 : index
      %c0_27 = arith.constant 0 : index
      %42 = vector.load %arg8[%c0_26, %c0_27] : memref<1x16xf32, #tpu.memory_space<vmem>>, vector<1x16xf32>
      tpu.vector_store %arg8[%c0_26, %c0_27], %41 {strides = array<i32>} : memref<1x16xf32, #tpu.memory_space<vmem>>, vector<1x16xf32>,
    } else {
    }
    %c0_i32_18 = arith.constant 0 : i32
    %32 = arith.cmpi eq, %arg2, %c0_i32_18 : i32
    %c0_i32_19 = arith.constant 0 : i32
    %33 = arith.cmpi eq, %arg3, %c0_i32_19 : i32
    %34 = arith.andi %32, %33 : i1
    %35 = arith.extui %34 : i1 to i32
    %c0_i32_20 = arith.constant 0 : i32
    %36 = arith.cmpi ne, %35, %c0_i32_20 : i32
    scf.if %36 {
      %c0_21 = arith.constant 0 : index
      %c0_22 = arith.constant 0 : index
      %37 = vector.load %arg8[%c0_21, %c0_22] : memref<1x16xf32, #tpu.memory_space<vmem>>, vector<1x16xf32>
      %cst_23 = arith.constant dense<0xFF800000> : vector<1xf32>
      %38 = vector.multi_reduction <maximumf>, %37, %cst_23 [1] : vector<1x16xf32> to vector<1xf32>
      %39 = vector.shape_cast %38 : vector<1xf32> to vector<1x1xf32>
      %40 = vector.shape_cast %39 : vector<1x1xf32> to vector<1x1x1x1xf32>
      %c0_24 = arith.constant 0 : index
      %c0_25 = arith.constant 0 : index
      %c0_26 = arith.constant 0 : index
      %c0_27 = arith.constant 0 : index
      %41 = vector.load %arg6[%c0_24, %c0_25, %c0_26, %c0_27] : memref<1x1x1x1xf32, #tpu.memory_space<vmem>>, vector<1x1x1x1xf32>
      tpu.vector_store %arg6[%c0_24, %c0_25, %c0_26, %c0_27], %40 {strides = array<i32>} : memref<1x1x1x1xf32, #tpu.memory_space<vmem>>, vector<1x1x1x1xf32>,
    } else {
    }
    return
  }
  func.func @transform_0(%arg0: i32, %arg1: i32, %arg2: i32, %arg3: i32) -> (i32, i32, i32) {
    %c1_i32 = arith.constant 1 : i32
    %0 = arith.muli %arg1, %c1_i32 : i32
    %1 = arith.addi %0, %arg2 : i32
    %c0_i32 = arith.constant 0 : i32
    return %arg0, %1, %arg3 : i32, i32, i32
  }
  func.func @transform_1(%arg0: i32, %arg1: i32, %arg2: i32, %arg3: i32) -> (i32, i32, i32) {
    %c1_i32 = arith.constant 1 : i32
    %0 = arith.muli %arg1, %c1_i32 : i32
    %1 = arith.addi %0, %arg2 : i32
    %c0_i32 = arith.constant 0 : i32
    return %arg0, %1, %arg3 : i32, i32, i32
  }
  func.func @transform_2(%arg0: i32, %arg1: i32, %arg2: i32, %arg3: i32) -> (i32, i32, i32, i32) {
    %c0_i32 = arith.constant 0 : i32
    %c0_i32_0 = arith.constant 0 : i32
    %c0_i32_1 = arith.constant 0 : i32
    return %arg0, %arg1, %c0_i32, %c0_i32_0 : i32, i32, i32, i32
  }
}

</mosaic_0001>

<bundles_post_ra>
// kernel: tpu_custom_call.1
= control target key start
LH: loop header
LB: loop body
LE: loop exit
PB: predicated region body
PF: predicated region fallthrough
CT: control target
= control target key end

     0   :  { %7 = vsyncpa [#allocation5], 0  ;;  %s1097_s0 = inlined_call_operand.hbm [shape: f32[2,16,128], index: 0, kind: input, shape index: {}]   ;;  %s1098_s1 = inlined_call_operand.hbm [shape: f32[2,16,128], index: 1, kind: input, shape index: {}]   ;;  %s1099_s2 = inlined_call_operand.vmem [shape: f32[2,1,1,1], index: 2, kind: output, shape index: {}]  }
   0x1   :  { %9 = vsyncpa [#allocation5 + $0x1], 0 }
   0x2   :  { %10 = vsyncpa [#allocation7], 0 }
   0x3   :  { %12 = vsyncpa [#allocation7 + $0x1], 0  ;;  %s877_s9 = smov 0   ;;  %s879_s10 = smov 0  }
   0x4   :  { %s881_s11 = smov 0   ;;  %s883_s12 = smov 0  }
   0x5   :  { %s885_s13 = smov 0   ;;  %s887_s14 = smov 0  }
   0x6 LB: > { %s641_s15 = sadd.s32 4294967295, %s852_s14   ;;  %s44_s16 = sadd.s32 1, %s848_s13  ;;  %s852_s14 = sphi %s887_s14, %s18_s14   ;;  %s848_s13 = sphi %s885_s13, %s1110_s13   ;;  %s844_s12 = sphi %s883_s12, %s1109_s12   ;;  %s840_s11 = sphi %s881_s11, %s1108_s11   ;;  %s836_s10 = sphi %s879_s10, %s1107_s10   ;;  %s832_s9 = sphi %s877_s9, %s1106_s9  }
   0x7   : > { %p46_p0 = scmp.ge.s32.totalorder %s44_s16, 2  ;;  %s57_s17 = sadd.s32 1, %s840_s11 }
   0x8   : > { %p64_p1 = scmp.ne.s32.totalorder %s840_s11, %s836_s10  ;;  %p65_p2 = scmp.eq.s32.totalorder %s852_s14, 0 }
   0x9   : > { %s1112_s16 = smov (%p46_p0, %s44_s16), 0  ;;  %p70_p4 = scmp.ne.s32.totalorder %s836_s10, %s832_s9 }
   0xa   : > { %p913_p3 = por %p65_p2, %p64_p1  ;;  %s50_s19 = ssub.s32 %s848_s13, %s1112_s16 }
   0xb   : > { %p71_p5 = scmp.eq.s32.totalorder %s641_s15, 0  ;;  %p55_p6 = scmp.eq.s32.totalorder %s50_s19, 0 }
   0xc   : > { %p669_p8 = scmp.lt.s32.totalorder %s852_s14, 2  ;;  %s929_s22 = sand.u32 1, %s840_s11  }
   0xd   : > { %p920_p7 = por %p71_p5, %p70_p4  ;;  %s656_s23 = sshll.u32 %s848_s13, 8 }
   0xe   : > { %s926_s21 = scalar_select %p55_p6, %s840_s11, %s57_s17  }
   0xf   : > { %s1102_s20 = scalar_select %p920_p7, 1, 0 }
  0x10   : > { %s645_s24 = sshll.u32 %s929_s22, 4  ;;  %s938_s27 = scalar_lea.hbm %s1097_s0, %s656_s23 }
  0x11   : > { %s158_s28 = scalar_lea.vmem [#allocation4], %s645_s24  ;;  %p944_p9 = pnand %p669_p8, %p913_p3 }
  0x12   : > { %s169_s29 = sshll.u32 %s158_s28, 4  ;;  %s155_s3 = scalar_lea.sflag [#allocation5], %s929_s22  ;;  %s948_s29 = int_to_ptr.vmem [resolvable:$true] %s169_s29 }
  0x13   : > { %s738_s4 = scalar_lea.hbm %s938_s27, 256  ;;  %p740_p11 = pneg %p944_p9 }
  0x14   : > { %p739_p10 = scmp.ne.s32.totalorder %s938_s27, %s738_s4  ;;  %s743_s7 = scalar_lea.hbm %s1097_s0, 512 }
  0x15   : > { %p744_p0 = scmp.lt.u32.totalorder %s938_s27, %s1097_s0  ;;  %p745_p1 = scmp.lt.u32.totalorder %s743_s7, %s738_s4 }
  0x16   : > { %p741_p12 = pnand %p740_p11, %p739_p10  ;;  %p747_p3 = scmp.lt.u32.totalorder %s738_s4, %s938_s27 }
  0x17   : > { %p746_p2 = por %p745_p1, %p744_p0 }
  0x18   : > { %p742_p13 = pneg %p741_p12 }
  0x19   : > { %p748_p4 = por %p747_p3, %p746_p2 }
  0x1b   : > { %p749_p5 = pnand %p748_p4, %p742_p13 }
  0x1d   : > { %752 = shalt.err (!%p749_p5)
}
  0x1e   : > { %s753_s15 = scalar_lea.vmem %s948_s29, 256  ;;  %s854_s17 = smov [#allocation4]  }
  0x1f   : > { %p754_p6 = scmp.ne.s32.totalorder %s948_s29, %s753_s15  ;;  %s758_s18 = sshll.u32 %s854_s17, 4  ;;  %s759_s18 = int_to_ptr.vmem [resolvable:$false] %s758_s18 }
  0x20   : > { %s760_s19 = scalar_lea.vmem %s759_s18, 512  ;;  %p761_p12 = scmp.lt.s32.totalorder %s948_s29, %s759_s18 }
  0x21   : > { %p756_p8 = pnand %p754_p6, %p740_p11  ;;  %p762_p0 = scmp.lt.s32.totalorder %s760_s19, %s753_s15 }
  0x23   : > { %p757_p10 = pneg %p756_p8  ;;  %p763_p1 = por %p762_p0, %p761_p12 }
  0x25   : > { %p764_p2 = pnand %p763_p1, %p757_p10 }
  0x27   : > { %767 = shalt.err (!%p764_p2)
}
  0x28   : > { %s855_s25 = smov 128   ;;  %s856_s26 = smov 8  }
  0x29   : > { %665 = dma.hbm_to_vmem [thread:$0]  (!%p944_p9), %s938_s27, 256, %s948_s29, %s155_s3, %s855_s25, %s855_s25, %s856_s26  }
  0x2a   : > { %p651_p13 = scmp.ge.s32.totalorder %s852_s14, 1  ;;  %p202_p3 = scmp.lt.s32.totalorder %s852_s14, 3 }
  0x2b   : > { %s992_s6 = scalar_lea.hbm %s1098_s1, %s656_s23  ;;  %s183_s7 = scalar_lea.vmem [#allocation6], %s645_s24 }
  0x2c   : > { %p983_p4 = pnand %p651_p13, %p202_p3  ;;  %s194_s8 = sshll.u32 %s183_s7, 4  ;;  %s996_s8 = int_to_ptr.vmem [resolvable:$true] %s194_s8 }
  0x2d   : > { %s180_s27 = scalar_lea.sflag [#allocation7], %s929_s22  ;;  %s768_s29 = scalar_lea.hbm %s992_s6, 256 }
  0x2e   : > { %p769_p5 = scmp.ne.s32.totalorder %s992_s6, %s768_s29  ;;  %s773_s23 = scalar_lea.hbm %s1098_s1, 512 }
  0x2f   : > { %p774_p10 = scmp.lt.u32.totalorder %s992_s6, %s1098_s1  ;;  %p775_p12 = scmp.lt.u32.totalorder %s773_s23, %s768_s29 }
  0x30   : > { %p771_p6 = pnand %p769_p5, %p740_p11  ;;  %p777_p1 = scmp.lt.u32.totalorder %s768_s29, %s992_s6 }
  0x31   : > { %p776_p0 = por %p775_p12, %p774_p10 }
  0x32   : > { %p772_p8 = pneg %p771_p6 }
  0x33   : > { %p778_p2 = por %p777_p1, %p776_p0 }
  0x35   : > { %p779_p13 = pnand %p778_p2, %p772_p8 }
  0x37   : > { %782 = shalt.err (!%p779_p13)
}
  0x38   : > { %s783_s24 = scalar_lea.vmem %s996_s8, 256  ;;  %s857_s18 = smov [#allocation6]  }
  0x39   : > { %p784_p3 = scmp.ne.s32.totalorder %s996_s8, %s783_s24  ;;  %s788_s19 = sshll.u32 %s857_s18, 4  ;;  %s789_s19 = int_to_ptr.vmem [resolvable:$false] %s788_s19 }
  0x3a   : > { %s790_s4 = scalar_lea.vmem %s789_s19, 512  ;;  %p791_p7 = scmp.lt.s32.totalorder %s996_s8, %s789_s19 }
  0x3b   : > { %p786_p5 = pnand %p784_p3, %p740_p11  ;;  %p792_p10 = scmp.lt.s32.totalorder %s790_s4, %s783_s24 }
  0x3d   : > { %p787_p6 = pneg %p786_p5  ;;  %p793_p12 = por %p792_p10, %p791_p7 }
  0x3f   : > { %p794_p0 = pnand %p793_p12, %p787_p6 }
  0x41   : > { %797 = shalt.err (!%p794_p0)
}
  0x42   : > { %668 = dma.hbm_to_vmem [thread:$0]  (!%p944_p9), %s992_s6, 256, %s996_s8, %s180_s27, %s855_s25, %s855_s25, %s856_s26  }
  0x43   : > { %206 = sbr.rel (%p983_p4) target bundleno = 578 (0x242), region = 28  ;;  %s208_s5 = sand.u32 (!%p983_p4), 1, %s836_s10  }
  0x44   : > { %s652_s7 = sshll.u32 (!%p983_p4), %s208_s5, 4  ;;  %s209_s29 = scalar_lea.sflag (!%p983_p4), [#allocation5], %s208_s5 }
  0x45   : > { %s212_s3 = scalar_lea.vmem (!%p983_p4), [#allocation4], %s652_s7  ;;  %p1105_p7 = scmp.ne.s32.totalorder (!%p983_p4), %s1102_s20, 0 }
  0x4a   : > { %823 = dma.done.wait (%p1105_p7), %s209_s29, 256  }
  0x4b   : > { %825 = vsyncadd (%p1105_p7), %s209_s29, 4294967040  ;;  %s218_s30 = scalar_lea.sflag [#allocation7], %s208_s5  ;;  %s221_s22 = scalar_lea.vmem [#allocation6], %s652_s7 }
  0x4c   : > { %827 = dma.done.wait (%p1105_p7), %s218_s30, 256  }
  0x4d   : > { %829 = vsyncadd (%p1105_p7), %s218_s30, 4294967040  ;;  %v271_v0 = vld [vmem:[%s212_s3] sm:$0xff]  ;;  %v272_v2 = vld [vmem:[%s212_s3 + $0x8] sm:$0xff]  ;;  %v858_v32 = vmov 0   ;;  %v310_v33 = vlaneseq  ;;  %v859_v34 = vmov 1966171168  }
  0x4e   : > { %v273_v1 = vld [vmem:[%s221_s22] sm:$0xff]  ;;  %v274_v4 = vld [vmem:[%s221_s22 + $0x8] sm:$0xff]  ;;  %724 = vset.pattern.permute.xlu1 %v858_v32  ;;  %725 = vset.pattern.permute.xlu0 %v858_v32  ;;  %v379_v35 = vunpack.c.l.s4 %v859_v34  ;;  %vm264_vm0 = vcmask 122880   ;;  %vm489_vm1 = vcmask 130112   ;;  %p252_p9 = scmp.lt.s32.totalorder %s844_s12, 1  ;;  %vm523_vm2 = vcmask 0  }
  0x4f   : > { %v275_v3 = vadd.f32 %v273_v1, %v271_v0  ;;  %v276_v5 = vadd.f32 %v274_v4, %v272_v2  ;;  %v1039_v36 = vshrl.u32 %v310_v33, 7 }
  0x50   : > { %v380_v37 = vunpack.c.0.s8 %v379_v35  ;;  %s1114_s12 = smov (!%p252_p9, %s844_s12), 1 }
  0x51   : > { %v277_v6 = vmul.f32 0.5, %v275_v3  ;;  %v278_v7 = vmul.f32 0.5, %v276_v5  ;;  %v312_v38 = vsub.s32 0, %v1039_v36  ;;  %v316_v39 = vsub.s32 1, %v1039_v36  ;;  %s257_s26 = scalar_lea.vmem %s1099_s2, %s1114_s12 }
  0x52   : > { %v320_v40 = vsub.s32 2, %v1039_v36  ;;  %v324_v41 = vsub.s32 3, %v1039_v36  ;;  %v328_v42 = vsub.s32 4, %v1039_v36  ;;  %v332_v43 = vsub.s32 5, %v1039_v36 }
  0x53   : > { %726 = vrcp.f32 %v277_v6  ;;  %v336_v44 = vsub.s32 6, %v1039_v36  ;;  %v340_v45 = vsub.s32 7, %v1039_v36  ;;  %v1050_v47 = vsub.s32 %v380_v37, %v1039_v36 }
  0x54   : > { %728 = vrcp.f32 %v278_v7 }
  0x5d   : > { %v727_v8 = vpop.eup %726 }
  0x5e   : > { %v729_v9 = vpop.eup %728  ;;  %v281_v10 = vmul.f32 %v727_v8, %v271_v0  ;;  %v291_v11 = vmul.f32 %v727_v8, %v273_v1 }
  0x5f   : > { %v282_v12 = vmul.f32 %v729_v9, %v272_v2  ;;  %v292_v13 = vmul.f32 %v729_v9, %v274_v4 }
  0x60   : > { %v283_v14 = vadd.f32 1e-07, %v281_v10  ;;  %v293_v15 = vadd.f32 1e-07, %v291_v11 }
  0x61   : > { %v284_v16 = vadd.f32 1e-07, %v282_v12  ;;  %v294_v17 = vadd.f32 1e-07, %v292_v13 }
  0x62   : > { %730 = vlog2.f32 %v283_v14 }
  0x63   : > { %732 = vlog2.f32 %v293_v15 }
  0x64   : > { %734 = vlog2.f32 %v284_v16 }
  0x65   : > { %736 = vlog2.f32 %v294_v17 }
  0x6c   : > { %v731_v18 = vpop.eup %730 }
  0x6d   : > { %v733_v19 = vpop.eup %732  ;;  %v286_v20 = vmul.f32 0.6931472, %v731_v18 }
  0x6e   : > { %v735_v21 = vpop.eup %734  ;;  %v296_v22 = vmul.f32 0.6931472, %v733_v19 }
  0x6f   : > { %v737_v23 = vpop.eup %736  ;;  %v289_v24 = vmul.f32 %v286_v20, %v271_v0  ;;  %v288_v25 = vmul.f32 0.6931472, %v735_v21 }
  0x70   : > { %v299_v26 = vmul.f32 %v296_v22, %v273_v1  ;;  %v298_v27 = vmul.f32 0.6931472, %v737_v23 }
  0x71   : > { %v290_v28 = vmul.f32 %v288_v25, %v272_v2 }
  0x72   : > { %v301_v29 = vadd.f32 %v299_v26, %v289_v24  ;;  %v300_v30 = vmul.f32 %v298_v27, %v274_v4  ;;  %v860_v27 = vmov 0.0  }
  0x73   : > { %270 = vst.msk [vmem:[#allocation2] sm:$0x1] %vm264_vm0, %v860_v27 }
  0x74   : > { %304 = vadd.xlane.f32.xlu0 %v301_v29  ;;  %v302_v31 = vadd.f32 %v300_v30, %v290_v28  ;;  %v861_v28 = vmov -inf   ;;  %v479_v29 = vand.u32 127, %v310_v33 }
  0x75   : > { %265 = vst.msk [vmem:[#allocation3] sm:$0x1] %vm264_vm0, %v861_v28 }
  0x76   : > { %v484_v30 = vadd.s32 4294967288, %v479_v29  ;;  %v482_v32 = vsub.s32 %v479_v29, %v1039_v36 }
  0x78   : > { %306 = vadd.xlane.f32.xlu0 %v302_v31  ;;  %v487_v34 = vsub.s32 %v484_v30, %v1039_v36 }
 0x101   : > { %v305_v46 = vpop.xlane.xlu0 %304 }
 0x102   : > { %v313_v48 = vrot.slane %v305_v46, %v312_v38  ;;  %v317_v49 = vrot.slane %v305_v46, %v316_v39  ;;  %v321_v50 = vrot.slane %v305_v46, %v320_v40  ;;  %v325_v51 = vrot.slane %v305_v46, %v324_v41 }
 0x103   : > { %v329_v52 = vrot.slane %v305_v46, %v328_v42  ;;  %v333_v53 = vrot.slane %v305_v46, %v332_v43  ;;  %v337_v54 = vrot.slane %v305_v46, %v336_v44  ;;  %v341_v55 = vrot.slane %v305_v46, %v340_v45 }
 0x104   : > { %v374_v56 = vcombine.low %v313_v48, %v317_v49  ;;  %v375_v57 = vcombine.low %v321_v50, %v325_v51 }
 0x105   : > { %v307_v58 = vpop.xlane.xlu0 %306  ;;  %v376_v59 = vcombine.low %v329_v52, %v333_v53  ;;  %v377_v60 = vcombine.low %v337_v54, %v341_v55 }
 0x106   : > { %v384_v61 = vrot.slane %v374_v56, %v1050_v47  ;;  %v391_v62 = vrot.slane %v375_v57, %v1050_v47  ;;  %v345_v63 = vrot.slane %v307_v58, %v312_v38  ;;  %v349_v0 = vrot.slane %v307_v58, %v316_v39 }
 0x107   : > { %v398_v1 = vrot.slane %v376_v59, %v1050_v47  ;;  %v405_v2 = vrot.slane %v377_v60, %v1050_v47  ;;  %v353_v3 = vrot.slane %v307_v58, %v320_v40  ;;  %v357_v4 = vrot.slane %v307_v58, %v324_v41  ;;  %v303_v41 = vld [vmem:[#allocation2] sm:$0x1] }
 0x108   : > { %v406_v5 = vcombine.low %v384_v61, %v391_v62  ;;  %v361_v6 = vrot.slane %v307_v58, %v328_v42  ;;  %v365_v7 = vrot.slane %v307_v58, %v332_v43  ;;  %v369_v8 = vrot.slane %v307_v58, %v336_v44  ;;  %v514_v44 = vld [vmem:[#allocation3] sm:$0x1] }
 0x109   : > { %v407_v9 = vcombine.low %v398_v1, %v405_v2  ;;  %v373_v10 = vrot.slane %v307_v58, %v340_v45  ;;  %v423_v11 = vcombine.low %v345_v63, %v349_v0  ;;  %v424_v12 = vcombine.low %v353_v3, %v357_v4 }
 0x10a   : > { %v414_v13 = vrot.slane %v406_v5, %v1050_v47  ;;  %v425_v14 = vcombine.low %v361_v6, %v365_v7 }
 0x10b   : > { %v421_v15 = vrot.slane %v407_v9, %v1050_v47  ;;  %v426_v16 = vcombine.low %v369_v8, %v373_v10  ;;  %v433_v17 = vrot.slane %v423_v11, %v1050_v47  ;;  %v440_v18 = vrot.slane %v424_v12, %v1050_v47 }
 0x10c   : > { %v447_v19 = vrot.slane %v425_v14, %v1050_v47 }
 0x10d   : > { %v422_v20 = vcombine.low %v414_v13, %v421_v15  ;;  %v454_v21 = vrot.slane %v426_v16, %v1050_v47  ;;  %v455_v22 = vcombine.low %v433_v17, %v440_v18 }
 0x10f   : > { %473 = vperm.xlu1 %724, %v422_v20   ;;  %v456_v23 = vcombine.low %v447_v19, %v454_v21  ;;  %v463_v24 = vrot.slane %v455_v22, %v1050_v47 }
 0x111   : > { %v470_v25 = vrot.slane %v456_v23, %v1050_v47 }
 0x113   : > { %v471_v26 = vcombine.low %v463_v24, %v470_v25 }
 0x115   : > { %476 = vperm.xlu1 %724, %v471_v26  }
 0x18e   : > { %v474_v31 = vpop.permute.xlu1 %473 }
 0x18f   : > { %v483_v37 = vrot.slane %v474_v31, %v482_v32 }
 0x194   : > { %v477_v35 = vpop.permute.xlu1 %476 }
 0x195   : > { %v488_v38 = vrot.slane %v477_v35, %v487_v34 }
 0x197   : > { %v490_v39 = vsel %vm489_vm1, %v488_v38, %v483_v37 }
 0x198   : > { %v497_v40 = vrot.slane %v490_v39, %v1050_v47 }
 0x19a   : > { %v504_v42 = vrot.slane %v497_v40, %v1050_v47 }
 0x19c   : > { %v506_v43 = vadd.f32 %v504_v42, %v303_v41 }
 0x19e   : > { %508 = vst.msk [vmem:[#allocation2] sm:$0x1] %vm264_vm0, %v506_v43 }
 0x1a5   : > { %v512_v33 = vld [vmem:[#allocation2] sm:$0x1] }
 0x1a6   : > { %v513_v45 = vmul.f32 0.5, %v512_v33 }
 0x1a8   : > { %v515_v46 = vmax.f32 %v514_v44, %v513_v45 }
 0x1aa   : > { %516 = vst.msk [vmem:[#allocation3] sm:$0x1] %vm264_vm0, %v515_v46 }
 0x1b1   : > { %v519_v36 = vld [vmem:[#allocation3] sm:$0x1] }
 0x1b2   : > { %v520_v48 = vsel %vm264_vm0, %v519_v36, -inf }
 0x1b3   : > { %521 = vmax.xlane.f32.xlu0 %v520_v48 }
 0x240   : > { %v522_v47 = vpop.xlane.xlu0 %521 }
 0x241   : > { %524 = vst.msk [vmem:[%s257_s26] sm:$0x1] %vm523_vm2, %v522_v47 }
 0x242 PF: > { %s18_s14 = sadd.s32 1, %s852_s14   ;;  %s1106_s9 = smov %s836_s10 }
 0x243   : > { %p15_p11 = scmp.ge.s32.totalorder %s18_s14, 4   ;;  %s1107_s10 = smov %s840_s11 }
 0x244   : > { %s1108_s11 = smov %s926_s21  ;;  %s1109_s12 = smov %s848_s13 }
 0x245   : > { %s1110_s13 = smov %s1112_s16  ;;  %17 = sbr.rel (!%p15_p11) target bundleno = 6 (0x6), region = 97 }
 0x24c   :  { %548 = vsyncpa [#allocation5], 1 }
 0x24d   :  { %550 = vsyncpa [#allocation5 + $0x1], 1 }
 0x24e   :  { %551 = vsyncpa [#allocation7], 1 }
 0x24f   :  { %553 = vsyncpa [#allocation7 + $0x1], 1 }

</bundles_post_ra>
